<compile_context>
chip_gen: v5e
topology: v5e:2x2
jax: 0.10.0
libtpu: 0.0.40
codegen_flags: <defaults>
</compile_context>

<pallas_src>
import jax
import jax.numpy as jnp
from jax.experimental import pallas as pl
from jax.experimental.pallas import tpu as pltpu


# ----------------------------- Pallas kernel -------------------------------

def _prior_network_kernel(codes_ref, train_ref, train_sq_ref,
                          w1_ref, b1_ref, w2u_ref, b2u_ref, w2s_ref, b2s_ref,
                          mu_ref, sigma_ref):
    q = codes_ref[...]          # (TB, C)   query codes (this batch tile)
    t = train_ref[...]          # (N,  C)   training-set codes (the KNN table)

    # ---- eval-mode pick_neighbor: exact nearest neighbor (Euclidean) -------
    # argmin_j ||q_i - t_j||^2 == argmin_j (||t_j||^2 - 2 q_i . t_j)
    scores = train_sq_ref[...] - 2.0 * jnp.dot(
        q, t.T, preferred_element_type=jnp.float32)             # (TB, N)
    row_min = jnp.min(scores, axis=-1, keepdims=True)           # (TB, 1)
    col_ids = jax.lax.broadcasted_iota(jnp.int32, scores.shape, 1)
    n_train = scores.shape[1]
    # smallest column index attaining the row minimum (== argmin tie-breaking)
    idx = jnp.min(jnp.where(scores <= row_min, col_ids, n_train),
                  axis=-1, keepdims=True)                        # (TB, 1)
    onehot = (col_ids == idx).astype(jnp.float32)                # (TB, N)
    # gather the chosen codes via a one-hot matmul (stays on the MXU, no DMA)
    prev = jnp.dot(onehot, t, preferred_element_type=jnp.float32)   # (TB, C)

    # ---- encode(): fc1 + ReLU, fc2_u, fc2_s, softplus + 1e-4 ---------------
    h1 = jnp.dot(prev, w1_ref[...], preferred_element_type=jnp.float32)
    h1 = jnp.maximum(h1 + b1_ref[...], 0.0)                      # (TB, H)
    mu = jnp.dot(h1, w2u_ref[...], preferred_element_type=jnp.float32) + b2u_ref[...]
    s = jnp.dot(h1, w2s_ref[...], preferred_element_type=jnp.float32) + b2s_ref[...]
    # numerically stable softplus(s) = max(s, 0) + log(1 + exp(-|s|))
    sigma = jnp.maximum(s, 0.0) + jnp.log(1.0 + jnp.exp(-jnp.abs(s))) + 1e-4
    mu_ref[...] = mu.astype(mu_ref.dtype)
    sigma_ref[...] = sigma.astype(sigma_ref.dtype)


# ------------------------------- wrapper ------------------------------------

def prior_network_forward(params, codes):
    """Eval-mode PriorNetwork.forward: returns (mu, sigma)."""
    B, C = codes.shape
    train = params["codes"]
    train_sq = params["codes_sqnorm"]
    N = train.shape[0]
    w1, b1 = params["fc1"]
    w2u, b2u = params["fc2_u"]
    w2s, b2s = params["fc2_s"]
    H = w1.shape[1]

    tb = B if B <= 128 else 128          # one batch tile per grid step
    assert B % tb == 0, "batch must tile evenly into the grid"
    grid = (B // tb,)

    fixed = lambda shape: pl.BlockSpec(shape, lambda i: (0, 0))  # resident block
    grid_spec = pltpu.PrefetchScalarGridSpec(
        num_scalar_prefetch=0,
        grid=grid,
        in_specs=[
            pl.BlockSpec((tb, C), lambda i: (i, 0)),   # query codes (batch-tiled)
            fixed((N, C)),                             # training codes
            fixed((1, N)),                             # precomputed ||t_j||^2 row
            fixed((C, H)), fixed((1, H)),              # fc1  (W^T, b)
            fixed((H, C)), fixed((1, C)),              # fc2_u
            fixed((H, C)), fixed((1, C)),              # fc2_s
        ],
        out_specs=[
            pl.BlockSpec((tb, C), lambda i: (i, 0)),   # mu
            pl.BlockSpec((tb, C), lambda i: (i, 0)),   # sigma
        ],
    )
    mu, sigma = pl.pallas_call(
        _prior_network_kernel,
        out_shape=(jax.ShapeDtypeStruct((B, C), jnp.float32),
                   jax.ShapeDtypeStruct((B, C), jnp.float32)),
        grid_spec=grid_spec,
        compiler_params=pltpu.CompilerParams(
            dimension_semantics=("parallel",)),  # v7x: shard batch tiles over both TCs
    )(codes, train, train_sq, w1, b1, w2u, b2u, w2s, b2s)
    return mu, sigma


# ------------------------------- params --------------------------------------

def init_params(key, code_length, n_hidden, size_training_set):
    """Synthetic parameters matching the PyTorch module shapes.

    Linear weights are stored pre-transposed as (in_features, out_features) and
    biases as (1, out_features) rows so no per-forward transpose/reshape is
    needed; training-code squared norms are precomputed for the NN search.
    """
    kc, k1w, k1b, kuw, kub, ksw, ksb = jax.random.split(key, 7)

    def linear(kw, kb, fan_in, fan_out):
        bound = 1.0 / jnp.sqrt(jnp.float32(fan_in))
        w = jax.random.uniform(kw, (fan_in, fan_out), jnp.float32, -bound, bound)
        b = jax.random.uniform(kb, (1, fan_out), jnp.float32, -bound, bound)
        return w, b

    train_codes = jax.random.normal(
        kc, (size_training_set, code_length), jnp.float32)
    return {
        "codes": train_codes,
        "codes_sqnorm": jnp.sum(train_codes * train_codes, axis=-1)[None, :],  # (1, N)
        "fc1": linear(k1w, k1b, code_length, n_hidden),
        "fc2_u": linear(kuw, kub, n_hidden, code_length),
        "fc2_s": linear(ksw, ksb, n_hidden, code_length),
    }


def reference_forward(params, codes):
    """Pure-JAX reference of eval-mode PriorNetwork.forward."""
    train = params["codes"]
    d2 = jnp.sum((codes[:, None, :] - train[None, :, :]) ** 2, axis=-1)
    prev = train[jnp.argmin(d2, axis=-1)]
    w1, b1 = params["fc1"]
    w2u, b2u = params["fc2_u"]
    w2s, b2s = params["fc2_s"]
    hp = jax.lax.Precision.HIGHEST
    h1 = jax.nn.relu(jnp.dot(prev, w1, precision=hp) + b1)
    mu = jnp.dot(h1, w2u, precision=hp) + b2u
    s = jnp.dot(h1, w2s, precision=hp) + b2s
    return mu, jax.nn.softplus(s) + 1e-4


# --------------------------------- main --------------------------------------

if __name__ == "__main__":
    code_length = 32          # self.code_length
    n_hidden = 512            # PriorNetwork default
    size_training_set = 256
    batch = 8

    key = jax.random.PRNGKey(0)
    kx, kp = jax.random.split(key)
    codes = jax.random.normal(kx, (batch, code_length), jnp.float32)
    params = init_params(kp, code_length, n_hidden, size_training_set)

    mu, sigma = prior_network_forward(params, codes)
    jax.block_until_ready((mu, sigma))

    mu_ref, sigma_ref = reference_forward(params, codes)
    assert mu.shape == (batch, code_length) and sigma.shape == (batch, code_length)
    assert bool(jnp.all(sigma > 0.0))
    assert jnp.allclose(mu, mu_ref, rtol=1e-3, atol=1e-3)
    assert jnp.allclose(sigma, sigma_ref, rtol=1e-3, atol=1e-3)
    print("KERNEL_OK")
</pallas_src>

<mosaic_0001>
module attributes {stable_mosaic.version = 11 : i64} {
  func.func @_prior_network_kernel(%arg0: i32, %arg1: memref<8x32xf32, #tpu.memory_space<vmem>>, %arg2: memref<256x32xf32, #tpu.memory_space<vmem>>, %arg3: memref<1x256xf32, #tpu.memory_space<vmem>>, %arg4: memref<32x512xf32, #tpu.memory_space<vmem>>, %arg5: memref<1x512xf32, #tpu.memory_space<vmem>>, %arg6: memref<512x32xf32, #tpu.memory_space<vmem>>, %arg7: memref<1x32xf32, #tpu.memory_space<vmem>>, %arg8: memref<512x32xf32, #tpu.memory_space<vmem>>, %arg9: memref<1x32xf32, #tpu.memory_space<vmem>>, %arg10: memref<8x32xf32, #tpu.memory_space<vmem>>, %arg11: memref<8x32xf32, #tpu.memory_space<vmem>>) attributes {dimension_semantics = [#tpu.dimension_semantics<parallel>], iteration_bounds = array<i64: 1>, scalar_prefetch = 0 : i64, scratch_operands = 0 : i64, tpu.core_type = #tpu.core_type<tc>, window_params = [{transform_indices = @transform_0, window_bounds = array<i64: 8, 32>}, {pipeline_mode = #tpu.pipeline_mode<synchronous>, transform_indices = @transform_1, window_bounds = array<i64: 256, 32>}, {pipeline_mode = #tpu.pipeline_mode<synchronous>, transform_indices = @transform_2, window_bounds = array<i64: 1, 256>}, {pipeline_mode = #tpu.pipeline_mode<synchronous>, transform_indices = @transform_3, window_bounds = array<i64: 32, 512>}, {pipeline_mode = #tpu.pipeline_mode<synchronous>, transform_indices = @transform_4, window_bounds = array<i64: 1, 512>}, {pipeline_mode = #tpu.pipeline_mode<synchronous>, transform_indices = @transform_5, window_bounds = array<i64: 512, 32>}, {pipeline_mode = #tpu.pipeline_mode<synchronous>, transform_indices = @transform_6, window_bounds = array<i64: 1, 32>}, {pipeline_mode = #tpu.pipeline_mode<synchronous>, transform_indices = @transform_7, window_bounds = array<i64: 512, 32>}, {pipeline_mode = #tpu.pipeline_mode<synchronous>, transform_indices = @transform_8, window_bounds = array<i64: 1, 32>}, {transform_indices = @transform_9, window_bounds = array<i64: 8, 32>}, {transform_indices = @transform_10, window_bounds = array<i64: 8, 32>}]} {
    %c0 = arith.constant 0 : index
    %c0_0 = arith.constant 0 : index
    %0 = vector.load %arg1[%c0, %c0_0] : memref<8x32xf32, #tpu.memory_space<vmem>>, vector<8x32xf32>
    %c0_1 = arith.constant 0 : index
    %c0_2 = arith.constant 0 : index
    %1 = vector.load %arg2[%c0_1, %c0_2] : memref<256x32xf32, #tpu.memory_space<vmem>>, vector<256x32xf32>
    %c0_3 = arith.constant 0 : index
    %c0_4 = arith.constant 0 : index
    %2 = vector.load %arg3[%c0_3, %c0_4] : memref<1x256xf32, #tpu.memory_space<vmem>>, vector<1x256xf32>
    %3 = tpu.transpose %1, [1, 0] : vector<256x32xf32> -> vector<32x256xf32>
    %cst = arith.constant dense<0.000000e+00> : vector<8x256xf32>
    %4 = tpu.matmul %0, %3, %cst {dimension_numbers = #tpu.dot_dimension_numbers<[1], [0], [0], [1], [0, 0, 1, 1], [], []>} : vector<8x32xf32>, vector<32x256xf32>, vector<8x256xf32> -> vector<8x256xf32>
    %cst_5 = arith.constant 2.000000e+00 : f32
    %5 = vector.broadcast %cst_5 : f32 to vector<8x256xf32>
    %6 = arith.mulf %5, %4 : vector<8x256xf32>
    %7 = vector.broadcast %2 : vector<1x256xf32> to vector<8x256xf32>
    %8 = arith.subf %7, %6 : vector<8x256xf32>
    %cst_6 = arith.constant dense<0x7F800000> : vector<8xf32>
    %9 = vector.multi_reduction <minimumf>, %8, %cst_6 [1] : vector<8x256xf32> to vector<8xf32>
    %10 = vector.shape_cast %9 : vector<8xf32> to vector<8x1xf32>
    %11 = tpu.iota {dimensions = array<i32: 1>} : vector<8x256xi32>
    %12 = vector.broadcast %10 : vector<8x1xf32> to vector<8x256xf32>
    %13 = arith.cmpf ole, %8, %12 : vector<8x256xf32>
    %c256_i32 = arith.constant 256 : i32
    %14 = vector.broadcast %c256_i32 : i32 to vector<8x256xi32>
    %15 = arith.select %13, %11, %14 : vector<8x256xi1>, vector<8x256xi32>
    %cst_7 = arith.constant dense<2147483647> : vector<8xi32>
    %16 = vector.multi_reduction <minsi>, %15, %cst_7 [1] : vector<8x256xi32> to vector<8xi32>
    %17 = vector.shape_cast %16 : vector<8xi32> to vector<8x1xi32>
    %18 = vector.broadcast %17 : vector<8x1xi32> to vector<8x256xi32>
    %19 = arith.cmpi eq, %11, %18 : vector<8x256xi32>
    %20 = arith.extui %19 : vector<8x256xi1> to vector<8x256xi32>
    %21 = arith.sitofp %20 : vector<8x256xi32> to vector<8x256xf32>
    %cst_8 = arith.constant dense<0.000000e+00> : vector<8x32xf32>
    %22 = tpu.matmul %21, %1, %cst_8 {dimension_numbers = #tpu.dot_dimension_numbers<[1], [0], [0], [1], [0, 0, 1, 1], [], []>} : vector<8x256xf32>, vector<256x32xf32>, vector<8x32xf32> -> vector<8x32xf32>
    %c0_9 = arith.constant 0 : index
    %c0_10 = arith.constant 0 : index
    %23 = vector.load %arg4[%c0_9, %c0_10] : memref<32x512xf32, #tpu.memory_space<vmem>>, vector<32x512xf32>
    %cst_11 = arith.constant dense<0.000000e+00> : vector<8x512xf32>
    %24 = tpu.matmul %22, %23, %cst_11 {dimension_numbers = #tpu.dot_dimension_numbers<[1], [0], [0], [1], [0, 0, 1, 1], [], []>} : vector<8x32xf32>, vector<32x512xf32>, vector<8x512xf32> -> vector<8x512xf32>
    %c0_12 = arith.constant 0 : index
    %c0_13 = arith.constant 0 : index
    %25 = vector.load %arg5[%c0_12, %c0_13] : memref<1x512xf32, #tpu.memory_space<vmem>>, vector<1x512xf32>
    %26 = vector.broadcast %25 : vector<1x512xf32> to vector<8x512xf32>
    %27 = arith.addf %24, %26 : vector<8x512xf32>
    %cst_14 = arith.constant 0.000000e+00 : f32
    %28 = vector.broadcast %cst_14 : f32 to vector<8x512xf32>
    %29 = arith.maximumf %27, %28 : vector<8x512xf32>
    %c0_15 = arith.constant 0 : index
    %c0_16 = arith.constant 0 : index
    %30 = vector.load %arg6[%c0_15, %c0_16] : memref<512x32xf32, #tpu.memory_space<vmem>>, vector<512x32xf32>
    %cst_17 = arith.constant dense<0.000000e+00> : vector<8x32xf32>
    %31 = tpu.matmul %29, %30, %cst_17 {dimension_numbers = #tpu.dot_dimension_numbers<[1], [0], [0], [1], [0, 0, 1, 1], [], []>} : vector<8x512xf32>, vector<512x32xf32>, vector<8x32xf32> -> vector<8x32xf32>
    %c0_18 = arith.constant 0 : index
    %c0_19 = arith.constant 0 : index
    %32 = vector.load %arg7[%c0_18, %c0_19] : memref<1x32xf32, #tpu.memory_space<vmem>>, vector<1x32xf32>
    %33 = vector.broadcast %32 : vector<1x32xf32> to vector<8x32xf32>
    %34 = arith.addf %31, %33 : vector<8x32xf32>
    %c0_20 = arith.constant 0 : index
    %c0_21 = arith.constant 0 : index
    %35 = vector.load %arg8[%c0_20, %c0_21] : memref<512x32xf32, #tpu.memory_space<vmem>>, vector<512x32xf32>
    %cst_22 = arith.constant dense<0.000000e+00> : vector<8x32xf32>
    %36 = tpu.matmul %29, %35, %cst_22 {dimension_numbers = #tpu.dot_dimension_numbers<[1], [0], [0], [1], [0, 0, 1, 1], [], []>} : vector<8x512xf32>, vector<512x32xf32>, vector<8x32xf32> -> vector<8x32xf32>
    %c0_23 = arith.constant 0 : index
    %c0_24 = arith.constant 0 : index
    %37 = vector.load %arg9[%c0_23, %c0_24] : memref<1x32xf32, #tpu.memory_space<vmem>>, vector<1x32xf32>
    %38 = vector.broadcast %37 : vector<1x32xf32> to vector<8x32xf32>
    %39 = arith.addf %36, %38 : vector<8x32xf32>
    %cst_25 = arith.constant 0.000000e+00 : f32
    %40 = vector.broadcast %cst_25 : f32 to vector<8x32xf32>
    %41 = arith.maximumf %39, %40 : vector<8x32xf32>
    %42 = math.absf %39 : vector<8x32xf32>
    %cst_26 = arith.constant 0.000000e+00 : f32
    %43 = vector.broadcast %cst_26 : f32 to vector<8x32xf32>
    %44 = arith.subf %43, %42 : vector<8x32xf32>
    %45 = math.exp %44 : vector<8x32xf32>
    %cst_27 = arith.constant 1.000000e+00 : f32
    %46 = vector.broadcast %cst_27 : f32 to vector<8x32xf32>
    %47 = arith.addf %46, %45 : vector<8x32xf32>
    %48 = math.log %47 : vector<8x32xf32>
    %49 = arith.addf %41, %48 : vector<8x32xf32>
    %cst_28 = arith.constant 9.99999974E-5 : f32
    %50 = vector.broadcast %cst_28 : f32 to vector<8x32xf32>
    %51 = arith.addf %49, %50 : vector<8x32xf32>
    %c0_29 = arith.constant 0 : index
    %c0_30 = arith.constant 0 : index
    %52 = vector.load %arg10[%c0_29, %c0_30] : memref<8x32xf32, #tpu.memory_space<vmem>>, vector<8x32xf32>
    tpu.vector_store %arg10[%c0_29, %c0_30], %34 {strides = array<i32>} : memref<8x32xf32, #tpu.memory_space<vmem>>, vector<8x32xf32>,
    %c0_31 = arith.constant 0 : index
    %c0_32 = arith.constant 0 : index
    %53 = vector.load %arg11[%c0_31, %c0_32] : memref<8x32xf32, #tpu.memory_space<vmem>>, vector<8x32xf32>
    tpu.vector_store %arg11[%c0_31, %c0_32], %51 {strides = array<i32>} : memref<8x32xf32, #tpu.memory_space<vmem>>, vector<8x32xf32>,
    return
  }
  func.func @transform_0(%arg0: i32) -> (i32, i32) {
    %c0_i32 = arith.constant 0 : i32
    %c0_i32_0 = arith.constant 0 : i32
    return %arg0, %c0_i32 : i32, i32
  }
  func.func @transform_1(%arg0: i32) -> (i32, i32) {
    %c0_i32 = arith.constant 0 : i32
    %c0_i32_0 = arith.constant 0 : i32
    %c0_i32_1 = arith.constant 0 : i32
    return %c0_i32, %c0_i32_0 : i32, i32
  }
  func.func @transform_2(%arg0: i32) -> (i32, i32) {
    %c0_i32 = arith.constant 0 : i32
    %c0_i32_0 = arith.constant 0 : i32
    %c0_i32_1 = arith.constant 0 : i32
    return %c0_i32, %c0_i32_0 : i32, i32
  }
  func.func @transform_3(%arg0: i32) -> (i32, i32) {
    %c0_i32 = arith.constant 0 : i32
    %c0_i32_0 = arith.constant 0 : i32
    %c0_i32_1 = arith.constant 0 : i32
    return %c0_i32, %c0_i32_0 : i32, i32
  }
  func.func @transform_4(%arg0: i32) -> (i32, i32) {
    %c0_i32 = arith.constant 0 : i32
    %c0_i32_0 = arith.constant 0 : i32
    %c0_i32_1 = arith.constant 0 : i32
    return %c0_i32, %c0_i32_0 : i32, i32
  }
  func.func @transform_5(%arg0: i32) -> (i32, i32) {
    %c0_i32 = arith.constant 0 : i32
    %c0_i32_0 = arith.constant 0 : i32
    %c0_i32_1 = arith.constant 0 : i32
    return %c0_i32, %c0_i32_0 : i32, i32
  }
  func.func @transform_6(%arg0: i32) -> (i32, i32) {
    %c0_i32 = arith.constant 0 : i32
    %c0_i32_0 = arith.constant 0 : i32
    %c0_i32_1 = arith.constant 0 : i32
    return %c0_i32, %c0_i32_0 : i32, i32
  }
  func.func @transform_7(%arg0: i32) -> (i32, i32) {
    %c0_i32 = arith.constant 0 : i32
    %c0_i32_0 = arith.constant 0 : i32
    %c0_i32_1 = arith.constant 0 : i32
    return %c0_i32, %c0_i32_0 : i32, i32
  }
  func.func @transform_8(%arg0: i32) -> (i32, i32) {
    %c0_i32 = arith.constant 0 : i32
    %c0_i32_0 = arith.constant 0 : i32
    %c0_i32_1 = arith.constant 0 : i32
    return %c0_i32, %c0_i32_0 : i32, i32
  }
  func.func @transform_9(%arg0: i32) -> (i32, i32) {
    %c0_i32 = arith.constant 0 : i32
    %c0_i32_0 = arith.constant 0 : i32
    return %arg0, %c0_i32 : i32, i32
  }
  func.func @transform_10(%arg0: i32) -> (i32, i32) {
    %c0_i32 = arith.constant 0 : i32
    %c0_i32_0 = arith.constant 0 : i32
    return %arg0, %c0_i32 : i32, i32
  }
}

</mosaic_0001>

<bundles_post_ra>
// kernel: tpu_custom_call.1
= control target key start
LH: loop header
LB: loop body
LE: loop exit
PB: predicated region body
PF: predicated region fallthrough
CT: control target
= control target key end

     0   :  { %16 = vsyncpa [#allocation3], 0  ;;  %vm70_vm0 = vcmask 261120   ;;  %s1494_s0 = inlined_call_operand.vmem [shape: f32[8,32], index: 0, kind: input, shape index: {}]   ;;  %s1495_s1 = inlined_call_operand.vmem [shape: f32[256,32], index: 1, kind: input, shape index: {}]   ;;  %s1496_s2 = inlined_call_operand.vmem [shape: f32[1,256], index: 2, kind: input, shape index: {}]   ;;  %s1497_s3 = inlined_call_operand.vmem [shape: f32[32,512], index: 3, kind: input, shape index: {}]   ;;  %s1498_s4 = inlined_call_operand.vmem [shape: f32[1,512], index: 4, kind: input, shape index: {}]   ;;  %s1499_s5 = inlined_call_operand.vmem [shape: f32[512,32], index: 5, kind: input, shape index: {}]   ;;  %s1500_s6 = inlined_call_operand.vmem [shape: f32[1,32], index: 6, kind: input, shape index: {}]   ;;  %s1501_s7 = inlined_call_operand.vmem [shape: f32[512,32], index: 7, kind: input, shape index: {}]   ;;  %s1502_s8 = inlined_call_operand.vmem [shape: f32[1,32], index: 8, kind: input, shape index: {}]   ;;  %s1503_s9 = inlined_call_operand.hbm [shape: f32[8,32], index: 9, kind: output, shape index: {0}]   ;;  %s1504_s10 = inlined_call_operand.hbm [shape: f32[8,32], index: 10, kind: output, shape index: {1}]  }
   0x1   :  { %v52_v0 = vld [vmem:[%s1495_s1 + $0x78] sm:$0xff]  ;;  %v51_v2 = vld [vmem:[%s1495_s1 + $0x70] sm:$0xff]  ;;  %v50_v4 = vld [vmem:[%s1495_s1 + $0x68] sm:$0xff] }
   0x2   :  { %v68_v1 = vld [vmem:[%s1495_s1 + $0xf8] sm:$0xff]  ;;  %744 = vmatpush.xpose.msk.msra.mxu0 %vm70_vm0, %v52_v0  ;;  %v67_v3 = vld [vmem:[%s1495_s1 + $0xf0] sm:$0xff]  ;;  %251 = vmatpush.msra.mxu2 %v52_v0  ;;  %v66_v5 = vld [vmem:[%s1495_s1 + $0xe8] sm:$0xff] }
   0x3   :  { %761 = vmatpush.xpose.msk.msra.mxu1 %vm70_vm0, %v68_v1  ;;  %271 = vmatpush.msra.mxu3 %v68_v1  ;;  %v49_v6 = vld [vmem:[%s1495_s1 + $0x60] sm:$0xff] }
   0x4   :  { %252 = vmatpush.msra.mxu2 %v51_v2  ;;  %v65_v7 = vld [vmem:[%s1495_s1 + $0xe0] sm:$0xff] }
   0x5   :  { %272 = vmatpush.msra.mxu3 %v67_v3 }
   0x6   :  { %745 = vmatpush.xpose.msk.msra.mxu0 %vm70_vm0, %v51_v2  ;;  %253 = vmatpush.msra.mxu2 %v50_v4 }
   0x7   :  { %762 = vmatpush.xpose.msk.msra.mxu1 %vm70_vm0, %v67_v3  ;;  %273 = vmatpush.msra.mxu3 %v66_v5 }
   0x8   :  { %17 = vsyncpa [#allocation5], 0  ;;  %254 = vmatpush.msra.mxu2 %v49_v6  ;;  %v48_v8 = vld [vmem:[%s1495_s1 + $0x58] sm:$0xff]  ;;  %v47_v10 = vld [vmem:[%s1495_s1 + $0x50] sm:$0xff]  ;;  %v222_v43 = vlaneseq  ;;  %v847_v2 = vmov 1.0   ;;  %s848_s18 = smov [#allocation2]  }
   0x9   :  { %274 = vmatpush.msra.mxu3 %v65_v7  ;;  %v64_v9 = vld [vmem:[%s1495_s1 + $0xd8] sm:$0xff]  ;;  %v63_v11 = vld [vmem:[%s1495_s1 + $0xd0] sm:$0xff]  ;;  %v46_v12 = vld [vmem:[%s1495_s1 + $0x48] sm:$0xff]  ;;  %s717_s19 = sshll.u32 %s848_s18, 4  ;;  %s719_s20 = sshll.u32 %s1503_s9, 4  ;;  %s718_s19 = int_to_ptr.vmem [resolvable:$true] %s717_s19  ;;  %s720_s20 = int_to_ptr.hbm [resolvable:$true] %s719_s20 }
   0xa   :  { %746 = vmatpush.xpose.msk.msra.mxu0 %vm70_vm0, %v50_v4  ;;  %255 = vmatpush.msra.mxu2 %v48_v8  ;;  %v62_v13 = vld [vmem:[%s1495_s1 + $0xc8] sm:$0xff]  ;;  %v45_v14 = vld [vmem:[%s1495_s1 + $0x40] sm:$0xff]  ;;  %v44_v16 = vld [vmem:[%s1495_s1 + $0x38] sm:$0xff]  ;;  %v223_v44 = vand.u32 127, %v222_v43  ;;  %s730_s24 = sshll.u32 %s1504_s10, 4  ;;  %s731_s24 = int_to_ptr.hbm [resolvable:$true] %s730_s24 }
   0xb   :  { %763 = vmatpush.xpose.msk.msra.mxu1 %vm70_vm0, %v66_v5  ;;  %275 = vmatpush.msra.mxu3 %v64_v9  ;;  %v61_v15 = vld [vmem:[%s1495_s1 + $0xc0] sm:$0xff]  ;;  %v60_v17 = vld [vmem:[%s1495_s1 + $0xb8] sm:$0xff]  ;;  %v43_v18 = vld [vmem:[%s1495_s1 + $0x30] sm:$0xff] }
   0xc   :  { %256 = vmatpush.msra.mxu2 %v47_v10  ;;  %v59_v19 = vld [vmem:[%s1495_s1 + $0xb0] sm:$0xff]  ;;  %v42_v20 = vld [vmem:[%s1495_s1 + $0x28] sm:$0xff]  ;;  %v41_v22 = vld [vmem:[%s1495_s1 + $0x20] sm:$0xff]  ;;  %v224_v45 = vadd.s32 128, %v223_v44 }
   0xd   :  { %276 = vmatpush.msra.mxu3 %v63_v11  ;;  %v58_v21 = vld [vmem:[%s1495_s1 + $0xa8] sm:$0xff]  ;;  %v57_v23 = vld [vmem:[%s1495_s1 + $0xa0] sm:$0xff]  ;;  %v40_v24 = vld [vmem:[%s1495_s1 + $0x18] sm:$0xff] }
   0xe   :  { %747 = vmatpush.xpose.msk.msra.mxu0 %vm70_vm0, %v49_v6  ;;  %257 = vmatpush.msra.mxu2 %v46_v12  ;;  %v56_v25 = vld [vmem:[%s1495_s1 + $0x98] sm:$0xff]  ;;  %v39_v26 = vld [vmem:[%s1495_s1 + $0x10] sm:$0xff]  ;;  %v38_v28 = vld [vmem:[%s1495_s1 + $0x8] sm:$0xff] }
   0xf   :  { %764 = vmatpush.xpose.msk.msra.mxu1 %vm70_vm0, %v65_v7  ;;  %277 = vmatpush.msra.mxu3 %v62_v13  ;;  %v55_v27 = vld [vmem:[%s1495_s1 + $0x90] sm:$0xff]  ;;  %v54_v29 = vld [vmem:[%s1495_s1 + $0x88] sm:$0xff]  ;;  %v37_v30 = vld [vmem:[%s1495_s1] sm:$0xff] }
  0x10   :  { %258 = vmatpush.msra.mxu2 %v45_v14  ;;  %v53_v31 = vld [vmem:[%s1495_s1 + $0x80] sm:$0xff]  ;;  %v304_v57 = vld [vmem:[%s1497_s3 + $0x68] sm:$0xff]  ;;  %v305_v6 = vld [vmem:[%s1497_s3 + $0x70] sm:$0xff] }
  0x11   :  { %278 = vmatpush.msra.mxu3 %v61_v15  ;;  %v36_v32 = vld [vmem:[%s1494_s0] sm:$0xff]  ;;  %v300_v59 = vld [vmem:[%s1497_s3 + $0x48] sm:$0xff]  ;;  %v306_v7 = vld [vmem:[%s1497_s3 + $0x78] sm:$0xff] }
  0x12   :  { %748 = vmatpush.xpose.msk.msra.mxu0 %vm70_vm0, %v48_v8  ;;  %259 = vmatpush.msra.mxu2 %v44_v16  ;;  %v69_v33 = vld [vmem:[%s1496_s2] sm:$0x3]  ;;  %v296_v3 = vld [vmem:[%s1497_s3 + $0x28] sm:$0xff]  ;;  %v301_v8 = vld [vmem:[%s1497_s3 + $0x50] sm:$0xff] }
  0x13   :  { %765 = vmatpush.xpose.msk.msra.mxu1 %vm70_vm0, %v64_v9  ;;  %279 = vmatpush.msra.mxu3 %v60_v17  ;;  %v213_v34 = vperm.slane %v69_v33, 0  ;;  %v214_v35 = vperm.slane %v69_v33, 1  ;;  %v303_v56 = vld [vmem:[%s1497_s3 + $0x60] sm:$0xff]  ;;  %v292_v5 = vld [vmem:[%s1497_s3 + $0x8] sm:$0xff]  ;;  %v302_v9 = vld [vmem:[%s1497_s3 + $0x58] sm:$0xff] }
  0x14   :  { %260 = vmatpush.msra.mxu2 %v43_v18  ;;  %v299_v58 = vld [vmem:[%s1497_s3 + $0x40] sm:$0xff]  ;;  %v458_v33 = vld [vmem:[%s1499_s5 + $0x1b0] sm:$0xff] }
  0x15   :  { %280 = vmatpush.msra.mxu3 %v59_v19  ;;  %v295_v60 = vld [vmem:[%s1497_s3 + $0x20] sm:$0xff] }
  0x16   :  { %749 = vmatpush.xpose.msk.msra.mxu0 %vm70_vm0, %v47_v10  ;;  %261 = vmatpush.msra.mxu2 %v42_v20  ;;  %v291_v4 = vld [vmem:[%s1497_s3] sm:$0xff]  ;;  %v297_v10 = vld [vmem:[%s1497_s3 + $0x30] sm:$0xff] }
  0x17   :  { %766 = vmatpush.xpose.msk.msra.mxu1 %vm70_vm0, %v63_v11  ;;  %281 = vmatpush.msra.mxu3 %v58_v21  ;;  %v298_v11 = vld [vmem:[%s1497_s3 + $0x38] sm:$0xff]  ;;  %v440_v43 = vld [vmem:[%s1499_s5 + $0x120] sm:$0xff] }
  0x18   :  { %262 = vmatpush.msra.mxu2 %v41_v22 }
  0x19   :  { %282 = vmatpush.msra.mxu3 %v57_v23 }
  0x1a   :  { %750 = vmatpush.xpose.msk.msra.mxu0 %vm70_vm0, %v46_v12  ;;  %263 = vmatpush.msra.mxu2 %v40_v24  ;;  %v293_v12 = vld [vmem:[%s1497_s3 + $0x10] sm:$0xff] }
  0x1b   :  { %767 = vmatpush.xpose.msk.msra.mxu1 %vm70_vm0, %v62_v13  ;;  %283 = vmatpush.msra.mxu3 %v56_v25  ;;  %v294_v13 = vld [vmem:[%s1497_s3 + $0x18] sm:$0xff] }
  0x1c   :  { %264 = vmatpush.msra.mxu2 %v39_v26 }
  0x1d   :  { %284 = vmatpush.msra.mxu3 %v55_v27 }
  0x1e   :  { %751 = vmatpush.xpose.msk.msra.mxu0 %vm70_vm0, %v45_v14  ;;  %265 = vmatpush.msra.mxu2 %v38_v28  ;;  %v451_v14 = vld [vmem:[%s1499_s5 + $0x178] sm:$0xff] }
  0x1f   :  { %768 = vmatpush.xpose.msk.msra.mxu1 %vm70_vm0, %v61_v15  ;;  %285 = vmatpush.msra.mxu3 %v54_v29  ;;  %v467_v15 = vld [vmem:[%s1499_s5 + $0x1f8] sm:$0xff] }
  0x20   :  { %266 = vmatpush.msra.mxu2 %v37_v30 }
  0x21   :  { %286 = vmatpush.msra.mxu3 %v53_v31 }
  0x22   :  { %752 = vmatpush.xpose.msk.msra.mxu0 %vm70_vm0, %v44_v16  ;;  %332 = vmatpush.msrb.mxu2 %v303_v56  ;;  %v450_v16 = vld [vmem:[%s1499_s5 + $0x170] sm:$0xff] }
  0x23   :  { %769 = vmatpush.xpose.msk.msra.mxu1 %vm70_vm0, %v60_v17  ;;  %352 = vmatpush.msrb.mxu3 %v304_v57  ;;  %v466_v17 = vld [vmem:[%s1499_s5 + $0x1f0] sm:$0xff]  ;;  %v437_v57 = vld [vmem:[%s1499_s5 + $0x108] sm:$0xff] }
  0x24   :  { %333 = vmatpush.msrb.mxu2 %v299_v58  ;;  %v430_v56 = vld [vmem:[%s1499_s5 + $0xd0] sm:$0xff]  ;;  %v453_v58 = vld [vmem:[%s1499_s5 + $0x188] sm:$0xff] }
  0x25   :  { %353 = vmatpush.msrb.mxu3 %v300_v59  ;;  %v413_v59 = vld [vmem:[%s1499_s5 + $0x48] sm:$0xff] }
  0x26   :  { %753 = vmatpush.xpose.msk.msra.mxu0 %vm70_vm0, %v43_v18  ;;  %334 = vmatpush.msrb.mxu2 %v295_v60  ;;  %v449_v18 = vld [vmem:[%s1499_s5 + $0x168] sm:$0xff] }
  0x27   :  { %770 = vmatpush.xpose.msk.msra.mxu1 %vm70_vm0, %v59_v19  ;;  %354 = vmatpush.msrb.mxu3 %v296_v3  ;;  %v465_v19 = vld [vmem:[%s1499_s5 + $0x1e8] sm:$0xff]  ;;  %v411_v3 = vld [vmem:[%s1499_s5 + $0x38] sm:$0xff] }
  0x28   :  { %335 = vmatpush.msrb.mxu2 %v291_v4  ;;  %v429_v60 = vld [vmem:[%s1499_s5 + $0xc8] sm:$0xff]  ;;  %v427_v4 = vld [vmem:[%s1499_s5 + $0xb8] sm:$0xff] }
  0x29   :  { %355 = vmatpush.msrb.mxu3 %v292_v5  ;;  %v598_v5 = vld [vmem:[%s1501_s7 + $0x170] sm:$0xff] }
  0x2a   :  { %754 = vmatpush.xpose.msk.msra.mxu0 %vm70_vm0, %v42_v20  ;;  %v448_v20 = vld [vmem:[%s1499_s5 + $0x160] sm:$0xff] }
  0x2b   :  { %771 = vmatpush.xpose.msk.msra.mxu1 %vm70_vm0, %v58_v21  ;;  %v464_v21 = vld [vmem:[%s1499_s5 + $0x1e0] sm:$0xff] }
  0x2e   :  { %755 = vmatpush.xpose.msk.msra.mxu0 %vm70_vm0, %v41_v22  ;;  %v447_v22 = vld [vmem:[%s1499_s5 + $0x158] sm:$0xff] }
  0x2f   :  { %772 = vmatpush.xpose.msk.msra.mxu1 %vm70_vm0, %v57_v23  ;;  %v463_v23 = vld [vmem:[%s1499_s5 + $0x1d8] sm:$0xff] }
  0x32   :  { %756 = vmatpush.xpose.msk.msra.mxu0 %vm70_vm0, %v40_v24  ;;  %v446_v24 = vld [vmem:[%s1499_s5 + $0x150] sm:$0xff] }
  0x33   :  { %773 = vmatpush.xpose.msk.msra.mxu1 %vm70_vm0, %v56_v25  ;;  %v462_v25 = vld [vmem:[%s1499_s5 + $0x1d0] sm:$0xff] }
  0x36   :  { %757 = vmatpush.xpose.msk.msra.mxu0 %vm70_vm0, %v39_v26  ;;  %v445_v26 = vld [vmem:[%s1499_s5 + $0x148] sm:$0xff] }
  0x37   :  { %774 = vmatpush.xpose.msk.msra.mxu1 %vm70_vm0, %v55_v27  ;;  %v461_v27 = vld [vmem:[%s1499_s5 + $0x1c8] sm:$0xff] }
  0x3a   :  { %758 = vmatpush.xpose.msk.msra.mxu0 %vm70_vm0, %v38_v28  ;;  %v444_v28 = vld [vmem:[%s1499_s5 + $0x140] sm:$0xff] }
  0x3b   :  { %775 = vmatpush.xpose.msk.msra.mxu1 %vm70_vm0, %v54_v29  ;;  %v460_v29 = vld [vmem:[%s1499_s5 + $0x1c0] sm:$0xff] }
  0x3e   :  { %759 = vmatpush.xpose.msk.msra.mxu0 %vm70_vm0, %v37_v30  ;;  %v443_v30 = vld [vmem:[%s1499_s5 + $0x138] sm:$0xff] }
  0x3f   :  { %776 = vmatpush.xpose.msk.msra.mxu1 %vm70_vm0, %v53_v31  ;;  %v459_v31 = vld [vmem:[%s1499_s5 + $0x1b8] sm:$0xff] }
  0x41   :  { %760 = vmatmul.msk.f32.vlgmr.msra.gmra.mxu0 %vm70_vm0, %v36_v32 }
  0x42   :  { %777 = vmatmul.msk.f32.vlgmr.msra.gmra.mxu1 %vm70_vm0, %v36_v32  ;;  %512 = vmatpush.msrb.mxu0 %v451_v14  ;;  %v442_v32 = vld [vmem:[%s1499_s5 + $0x130] sm:$0xff]  ;;  %v612_v14 = vld [vmem:[%s1501_s7 + $0x1e0] sm:$0xff] }
  0x43   :  { %532 = vmatpush.msrb.mxu1 %v467_v15  ;;  %v408_v15 = vld [vmem:[%s1499_s5 + $0x20] sm:$0xff] }
  0x44   :  { %513 = vmatpush.msrb.mxu0 %v450_v16  ;;  %v424_v16 = vld [vmem:[%s1499_s5 + $0xa0] sm:$0xff] }
  0x45   :  { %533 = vmatpush.msrb.mxu1 %v466_v17  ;;  %v595_v17 = vld [vmem:[%s1501_s7 + $0x158] sm:$0xff] }
  0x46   :  { %514 = vmatpush.msrb.mxu0 %v449_v18  ;;  %v611_v18 = vld [vmem:[%s1501_s7 + $0x1d8] sm:$0xff] }
  0x47   :  { %534 = vmatpush.msrb.mxu1 %v465_v19  ;;  %v407_v19 = vld [vmem:[%s1499_s5 + $0x18] sm:$0xff] }
  0x48   :  { %515 = vmatpush.msrb.mxu0 %v448_v20  ;;  %v423_v20 = vld [vmem:[%s1499_s5 + $0x98] sm:$0xff] }
  0x49   :  { %535 = vmatpush.msrb.mxu1 %v464_v21  ;;  %v406_v21 = vld [vmem:[%s1499_s5 + $0x10] sm:$0xff] }
  0x4a   :  { %516 = vmatpush.msrb.mxu0 %v447_v22  ;;  %v422_v22 = vld [vmem:[%s1499_s5 + $0x90] sm:$0xff] }
  0x4b   :  { %536 = vmatpush.msrb.mxu1 %v463_v23  ;;  %v405_v23 = vld [vmem:[%s1499_s5 + $0x8] sm:$0xff] }
  0x4c   :  { %517 = vmatpush.msrb.mxu0 %v446_v24  ;;  %v421_v24 = vld [vmem:[%s1499_s5 + $0x88] sm:$0xff] }
  0x4d   :  { %537 = vmatpush.msrb.mxu1 %v462_v25  ;;  %v404_v25 = vld [vmem:[%s1499_s5] sm:$0xff] }
  0x4e   :  { %518 = vmatpush.msrb.mxu0 %v445_v26  ;;  %v420_v26 = vld [vmem:[%s1499_s5 + $0x80] sm:$0xff] }
  0x4f   :  { %538 = vmatpush.msrb.mxu1 %v461_v27  ;;  %v567_v27 = vld [vmem:[%s1501_s7 + $0x78] sm:$0xff] }
  0x50   :  { %519 = vmatpush.msrb.mxu0 %v444_v28  ;;  %v583_v28 = vld [vmem:[%s1501_s7 + $0xf8] sm:$0xff] }
  0x51   :  { %539 = vmatpush.msrb.mxu1 %v460_v29  ;;  %v566_v29 = vld [vmem:[%s1501_s7 + $0x70] sm:$0xff] }
  0x52   :  { %520 = vmatpush.msrb.mxu0 %v443_v30  ;;  %v582_v30 = vld [vmem:[%s1501_s7 + $0xf0] sm:$0xff] }
  0x53   :  { %540 = vmatpush.msrb.mxu1 %v459_v31  ;;  %v565_v31 = vld [vmem:[%s1501_s7 + $0x68] sm:$0xff] }
  0x54   :  { %521 = vmatpush.msrb.mxu0 %v442_v32  ;;  %v581_v32 = vld [vmem:[%s1501_s7 + $0xe8] sm:$0xff] }
  0x55   :  { %541 = vmatpush.msrb.mxu1 %v458_v33  ;;  %v564_v33 = vld [vmem:[%s1501_s7 + $0x60] sm:$0xff] }
  0xbe   :  { %v187_v36 = vpop.f32.mrf.mxu0 }
  0xbf   :  { %v207_v37 = vpop.f32.mrf.mxu1  ;;  %v210_v38 = vmul.f32 2.0, %v187_v36 }
  0xc0   :  { %v211_v39 = vmul.f32 2.0, %v207_v37  ;;  %v419_v37 = vld [vmem:[%s1499_s5 + $0x78] sm:$0xff] }
  0xc1   :  { %v217_v40 = vsub.f32 %v213_v34, %v210_v38  ;;  %v435_v38 = vld [vmem:[%s1499_s5 + $0xf8] sm:$0xff] }
  0xc2   :  { %v218_v41 = vsub.f32 %v214_v35, %v211_v39  ;;  %v441_v39 = vld [vmem:[%s1499_s5 + $0x128] sm:$0xff] }
  0xc3   :  { %522 = vmatpush.msrb.mxu0 %v441_v39  ;;  %v561_v39 = vld [vmem:[%s1501_s7 + $0x48] sm:$0xff] }
  0xc4   :  { %v219_v42 = vmin.f32 %v217_v40, %v218_v41 }
  0xc5   :  { %523 = vmatpush.msrb.mxu0 %v440_v43  ;;  %v559_v43 = vld [vmem:[%s1501_s7 + $0x38] sm:$0xff] }
  0xc6   :  { %220 = vmin.xlane.f32.xlu0 %v219_v42  ;;  %v434_v42 = vld [vmem:[%s1499_s5 + $0xf0] sm:$0xff] }
 0x139   :  { %v221_v46 = vpop.xlane.xlu0 %220 }
 0x13a   :  { %vm225_vm1 = vcmp.le.f32.partialorder %v217_v40, %v221_v46  ;;  %vm226_vm2 = vcmp.le.f32.partialorder %v218_v41, %v221_v46  ;;  %v457_v40 = vld [vmem:[%s1499_s5 + $0x1a8] sm:$0xff]  ;;  %v418_v41 = vld [vmem:[%s1499_s5 + $0x70] sm:$0xff] }
 0x13b   :  { %v227_v47 = vsel %vm225_vm1, %v223_v44, 256  ;;  %v228_v48 = vsel %vm226_vm2, %v224_v45, 256  ;;  %v433_v46 = vld [vmem:[%s1499_s5 + $0xe8] sm:$0xff]  ;;  %542 = vmatpush.msrb.mxu1 %v457_v40 }
 0x13c   :  { %vm229_vm3 = vcmp.lt.s32.totalorder %v227_v47, %v228_v48  ;;  %v577_v40 = vld [vmem:[%s1501_s7 + $0xc8] sm:$0xff] }
 0x13d   :  { %v230_v49 = vsel %vm229_vm3, %v227_v47, %v228_v48  ;;  %v439_v47 = vld [vmem:[%s1499_s5 + $0x118] sm:$0xff] }
 0x13e   :  { %v232_v50 = vshra.s32 %v230_v49, 16  ;;  %v231_v52 = vand.u32 65535, %v230_v49  ;;  %v455_v48 = vld [vmem:[%s1499_s5 + $0x198] sm:$0xff]  ;;  %v416_v49 = vld [vmem:[%s1499_s5 + $0x60] sm:$0xff]  ;;  %524 = vmatpush.msrb.mxu0 %v439_v47  ;;  %v594_v47 = vld [vmem:[%s1501_s7 + $0x150] sm:$0xff] }
 0x140   :  { %v234_v51 = vcvt.s32.f32 %v232_v50  ;;  %v233_v54 = vcvt.s32.f32 %v231_v52  ;;  %v432_v50 = vld [vmem:[%s1499_s5 + $0xe0] sm:$0xff]  ;;  %v431_v52 = vld [vmem:[%s1499_s5 + $0xd8] sm:$0xff] }
 0x142   :  { %235 = vmin.xlane.f32.xlu0 %v234_v51 }
 0x1b5   :  { %v236_v53 = vpop.xlane.xlu0 %235 }
 0x1b6   :  { %vm237_vm4 = vcmp.eq.f32.partialorder %v234_v51, %v236_v53  ;;  %v242_v61 = vcvt.f32.s32 %v236_v53  ;;  %v415_v51 = vld [vmem:[%s1499_s5 + $0x58] sm:$0xff]  ;;  %v438_v53 = vld [vmem:[%s1499_s5 + $0x110] sm:$0xff] }
 0x1b7   :  { %v238_v55 = vsel %vm237_vm4, %v233_v54, inf  ;;  %v454_v54 = vld [vmem:[%s1499_s5 + $0x190] sm:$0xff]  ;;  %525 = vmatpush.msrb.mxu0 %v438_v53  ;;  %v556_v53 = vld [vmem:[%s1501_s7 + $0x20] sm:$0xff] }
 0x1b8   :  { %239 = vmin.xlane.f32.xlu1 %v238_v55  ;;  %v243_v63 = vshll.u32 %v242_v61, 16  ;;  %v414_v55 = vld [vmem:[%s1499_s5 + $0x50] sm:$0xff]  ;;  %v436_v61 = vld [vmem:[%s1499_s5 + $0x100] sm:$0xff] }
 0x1b9   :  { %526 = vmatpush.msrb.mxu0 %v437_v57  ;;  %v555_v57 = vld [vmem:[%s1501_s7 + $0x18] sm:$0xff] }
 0x1bb   :  { %527 = vmatpush.msrb.mxu0 %v436_v61  ;;  %v554_v61 = vld [vmem:[%s1501_s7 + $0x10] sm:$0xff] }
 0x22b   :  { %v240_v62 = vpop.xlane.xlu1 %239 }
 0x22c   :  { %v241_v0 = vcvt.f32.s32 %v240_v62  ;;  %v452_v62 = vld [vmem:[%s1499_s5 + $0x180] sm:$0xff] }
 0x22e   :  { %v244_v1 = vadd.s32 %v243_v63, %v241_v0  ;;  %v412_v63 = vld [vmem:[%s1499_s5 + $0x40] sm:$0xff] }
 0x22f   :  { %v428_v0 = vld [vmem:[%s1499_s5 + $0xc0] sm:$0xff] }
 0x230   :  { %vm245_vm5 = vcmp.eq.s32.totalorder %v223_v44, %v244_v1  ;;  %vm246_vm6 = vcmp.eq.s32.totalorder %v224_v45, %v244_v1  ;;  %v456_v44 = vld [vmem:[%s1499_s5 + $0x1a0] sm:$0xff]  ;;  %v417_v45 = vld [vmem:[%s1499_s5 + $0x68] sm:$0xff]  ;;  %v599_v1 = vld [vmem:[%s1501_s7 + $0x178] sm:$0xff] }
 0x231   :  { %780 = vmatmul.msk.f32.vlgmr.msra.gmra.mxu2 %vm245_vm5, %v847_v2  ;;  %781 = vmatmul.msk.f32.vlgmr.msra.gmra.mxu3 %vm246_vm6, %v847_v2  ;;  %v615_v2 = vld [vmem:[%s1501_s7 + $0x1f8] sm:$0xff] }
 0x232   :  { %372 = vmatpush.msra.mxu2 %v305_v6  ;;  %392 = vmatpush.msra.mxu3 %v306_v7  ;;  %v614_v6 = vld [vmem:[%s1501_s7 + $0x1f0] sm:$0xff] }
 0x233   :  { %543 = vmatpush.msrb.mxu1 %v456_v44  ;;  %v410_v7 = vld [vmem:[%s1499_s5 + $0x30] sm:$0xff]  ;;  %660 = vmatpush.msra.mxu0 %v599_v1  ;;  %v575_v44 = vld [vmem:[%s1501_s7 + $0xb8] sm:$0xff]  ;;  %v553_v1 = vld [vmem:[%s1501_s7 + $0x8] sm:$0xff] }
 0x234   :  { %373 = vmatpush.msra.mxu2 %v301_v8  ;;  %393 = vmatpush.msra.mxu3 %v302_v9  ;;  %v426_v8 = vld [vmem:[%s1499_s5 + $0xb0] sm:$0xff]  ;;  %v597_v9 = vld [vmem:[%s1501_s7 + $0x168] sm:$0xff] }
 0x235   :  { %544 = vmatpush.msrb.mxu1 %v455_v48  ;;  %661 = vmatpush.msra.mxu0 %v598_v5  ;;  %v610_v48 = vld [vmem:[%s1501_s7 + $0x1d0] sm:$0xff]  ;;  %v552_v5 = vld [vmem:[%s1501_s7] sm:$0xff] }
 0x236   :  { %374 = vmatpush.msra.mxu2 %v297_v10  ;;  %394 = vmatpush.msra.mxu3 %v298_v11  ;;  %v613_v10 = vld [vmem:[%s1501_s7 + $0x1e8] sm:$0xff] }
 0x237   :  { %545 = vmatpush.msrb.mxu1 %v454_v54  ;;  %v409_v11 = vld [vmem:[%s1499_s5 + $0x28] sm:$0xff]  ;;  %662 = vmatpush.msra.mxu0 %v597_v9  ;;  %v572_v54 = vld [vmem:[%s1501_s7 + $0xa0] sm:$0xff]  ;;  %v587_v9 = vld [vmem:[%s1501_s7 + $0x118] sm:$0xff] }
 0x238   :  { %375 = vmatpush.msra.mxu2 %v293_v12  ;;  %395 = vmatpush.msra.mxu3 %v294_v13  ;;  %v425_v12 = vld [vmem:[%s1499_s5 + $0xa8] sm:$0xff]  ;;  %v596_v13 = vld [vmem:[%s1501_s7 + $0x160] sm:$0xff] }
 0x239   :  { %546 = vmatpush.msrb.mxu1 %v453_v58  ;;  %663 = vmatpush.msra.mxu0 %v596_v13  ;;  %v571_v58 = vld [vmem:[%s1501_s7 + $0x98] sm:$0xff]  ;;  %v585_v13 = vld [vmem:[%s1501_s7 + $0x108] sm:$0xff] }
 0x23b   :  { %547 = vmatpush.msrb.mxu1 %v452_v62  ;;  %664 = vmatpush.msra.mxu0 %v595_v17  ;;  %v570_v62 = vld [vmem:[%s1501_s7 + $0x90] sm:$0xff]  ;;  %v307_v17 = vld [vmem:[%s1498_s4] sm:$0xf] }
 0x23d   :  { %680 = vmatpush.msra.mxu1 %v615_v2  ;;  %665 = vmatpush.msra.mxu0 %v594_v47  ;;  %v569_v2 = vld [vmem:[%s1501_s7 + $0x88] sm:$0xff] }
 0x23f   :  { %681 = vmatpush.msra.mxu1 %v614_v6  ;;  %v568_v6 = vld [vmem:[%s1501_s7 + $0x80] sm:$0xff] }
 0x241   :  { %682 = vmatpush.msra.mxu1 %v613_v10  ;;  %v603_v10 = vld [vmem:[%s1501_s7 + $0x198] sm:$0xff] }
 0x243   :  { %683 = vmatpush.msra.mxu1 %v612_v14  ;;  %v601_v14 = vld [vmem:[%s1501_s7 + $0x188] sm:$0xff] }
 0x245   :  { %684 = vmatpush.msra.mxu1 %v611_v18  ;;  %v309_v18 = vperm.slane %v307_v17, 0 }
 0x247   :  { %685 = vmatpush.msra.mxu1 %v610_v48 }
 0x2b4   :  { %v268_v34 = vpop.f32.mrf.mxu2  ;;  %v288_v35 = vpop.f32.mrf.mxu3 }
 0x2b5   :  { %v289_v36 = vadd.f32 %v288_v35, %v268_v34  ;;  %v580_v34 = vld [vmem:[%s1501_s7 + $0xe0] sm:$0xff]  ;;  %v563_v35 = vld [vmem:[%s1501_s7 + $0x58] sm:$0xff] }
 0x2b7   :  { %782 = vmatmul.msk.f32.vlgmr.msrb.gmra.mxu2 %vm70_vm0, %v289_v36  ;;  %783 = vmatmul.msk.f32.vlgmr.msrb.gmra.mxu3 %vm70_vm0, %v289_v36 }
 0x2b8   :  { %472 = vmatpush.msrb.mxu2 %v419_v37  ;;  %492 = vmatpush.msrb.mxu3 %v435_v38  ;;  %v562_v37 = vld [vmem:[%s1501_s7 + $0x50] sm:$0xff] }
 0x2b9   :  { %v578_v38 = vld [vmem:[%s1501_s7 + $0xd0] sm:$0xff] }
 0x2ba   :  { %473 = vmatpush.msrb.mxu2 %v418_v41  ;;  %493 = vmatpush.msrb.mxu3 %v434_v42  ;;  %v560_v41 = vld [vmem:[%s1501_s7 + $0x40] sm:$0xff] }
 0x2bb   :  { %v576_v42 = vld [vmem:[%s1501_s7 + $0xc0] sm:$0xff] }
 0x2bc   :  { %474 = vmatpush.msrb.mxu2 %v417_v45  ;;  %494 = vmatpush.msrb.mxu3 %v433_v46  ;;  %v558_v45 = vld [vmem:[%s1501_s7 + $0x30] sm:$0xff] }
 0x2bd   :  { %v574_v46 = vld [vmem:[%s1501_s7 + $0xb0] sm:$0xff] }
 0x2be   :  { %475 = vmatpush.msrb.mxu2 %v416_v49  ;;  %495 = vmatpush.msrb.mxu3 %v432_v50  ;;  %v557_v49 = vld [vmem:[%s1501_s7 + $0x28] sm:$0xff] }
 0x2bf   :  { %784 = vmatmul.msk.f32.vlgmr.msra.gmra.mxu2 %vm70_vm0, %v289_v36  ;;  %785 = vmatmul.msk.f32.vlgmr.msra.gmra.mxu3 %vm70_vm0, %v289_v36  ;;  %v579_v36 = vld [vmem:[%s1501_s7 + $0xd8] sm:$0xff]  ;;  %v573_v50 = vld [vmem:[%s1501_s7 + $0xa8] sm:$0xff] }
 0x2c0   :  { %476 = vmatpush.msrb.mxu2 %v415_v51  ;;  %496 = vmatpush.msrb.mxu3 %v431_v52  ;;  %v593_v51 = vld [vmem:[%s1501_s7 + $0x148] sm:$0xff] }
 0x2c1   :  { %v609_v52 = vld [vmem:[%s1501_s7 + $0x1c8] sm:$0xff]  ;;  %666 = vmatpush.msra.mxu0 %v593_v51 }
 0x2c2   :  { %477 = vmatpush.msrb.mxu2 %v414_v55  ;;  %497 = vmatpush.msrb.mxu3 %v430_v56  ;;  %v592_v55 = vld [vmem:[%s1501_s7 + $0x140] sm:$0xff] }
 0x2c3   :  { %686 = vmatpush.msra.mxu1 %v609_v52  ;;  %v608_v56 = vld [vmem:[%s1501_s7 + $0x1c0] sm:$0xff]  ;;  %667 = vmatpush.msra.mxu0 %v592_v55 }
 0x2c4   :  { %478 = vmatpush.msrb.mxu2 %v413_v59  ;;  %498 = vmatpush.msrb.mxu3 %v429_v60  ;;  %v591_v59 = vld [vmem:[%s1501_s7 + $0x138] sm:$0xff] }
 0x2c5   :  { %687 = vmatpush.msra.mxu1 %v608_v56  ;;  %v607_v60 = vld [vmem:[%s1501_s7 + $0x1b8] sm:$0xff]  ;;  %668 = vmatpush.msra.mxu0 %v591_v59 }
 0x2c6   :  { %479 = vmatpush.msrb.mxu2 %v412_v63  ;;  %499 = vmatpush.msrb.mxu3 %v428_v0  ;;  %v590_v63 = vld [vmem:[%s1501_s7 + $0x130] sm:$0xff] }
 0x2c7   :  { %688 = vmatpush.msra.mxu1 %v607_v60  ;;  %v606_v0 = vld [vmem:[%s1501_s7 + $0x1b0] sm:$0xff]  ;;  %669 = vmatpush.msra.mxu0 %v590_v63 }
 0x2c8   :  { %480 = vmatpush.msrb.mxu2 %v411_v3  ;;  %500 = vmatpush.msrb.mxu3 %v427_v4  ;;  %v589_v3 = vld [vmem:[%s1501_s7 + $0x128] sm:$0xff] }
 0x2c9   :  { %689 = vmatpush.msra.mxu1 %v606_v0  ;;  %v605_v4 = vld [vmem:[%s1501_s7 + $0x1a8] sm:$0xff]  ;;  %670 = vmatpush.msra.mxu0 %v589_v3 }
 0x2ca   :  { %481 = vmatpush.msrb.mxu2 %v410_v7  ;;  %501 = vmatpush.msrb.mxu3 %v426_v8  ;;  %v588_v7 = vld [vmem:[%s1501_s7 + $0x120] sm:$0xff] }
 0x2cb   :  { %690 = vmatpush.msra.mxu1 %v605_v4  ;;  %v604_v8 = vld [vmem:[%s1501_s7 + $0x1a0] sm:$0xff]  ;;  %671 = vmatpush.msra.mxu0 %v588_v7 }
 0x2cc   :  { %482 = vmatpush.msrb.mxu2 %v409_v11  ;;  %502 = vmatpush.msrb.mxu3 %v425_v12  ;;  %v586_v11 = vld [vmem:[%s1501_s7 + $0x110] sm:$0xff] }
 0x2cd   :  { %691 = vmatpush.msra.mxu1 %v604_v8  ;;  %672 = vmatpush.msra.mxu0 %v587_v9  ;;  %v602_v12 = vld [vmem:[%s1501_s7 + $0x190] sm:$0xff] }
 0x2ce   :  { %483 = vmatpush.msrb.mxu2 %v408_v15  ;;  %503 = vmatpush.msrb.mxu3 %v424_v16  ;;  %v584_v15 = vld [vmem:[%s1501_s7 + $0x100] sm:$0xff] }
 0x2cf   :  { %692 = vmatpush.msra.mxu1 %v603_v10  ;;  %673 = vmatpush.msra.mxu0 %v586_v11  ;;  %v600_v16 = vld [vmem:[%s1501_s7 + $0x180] sm:$0xff] }
 0x2d0   :  { %484 = vmatpush.msrb.mxu2 %v407_v19  ;;  %504 = vmatpush.msrb.mxu3 %v423_v20  ;;  %v310_v19 = vperm.slane %v307_v17, 1 }
 0x2d1   :  { %693 = vmatpush.msra.mxu1 %v602_v12  ;;  %674 = vmatpush.msra.mxu0 %v585_v13 }
 0x2d2   :  { %485 = vmatpush.msrb.mxu2 %v406_v21  ;;  %505 = vmatpush.msrb.mxu3 %v422_v22 }
 0x2d3   :  { %694 = vmatpush.msra.mxu1 %v601_v14  ;;  %675 = vmatpush.msra.mxu0 %v584_v15 }
 0x2d4   :  { %486 = vmatpush.msrb.mxu2 %v405_v23  ;;  %506 = vmatpush.msrb.mxu3 %v421_v24 }
 0x2d5   :  { %695 = vmatpush.msra.mxu1 %v600_v16 }
 0x2d6   :  { %487 = vmatpush.msrb.mxu2 %v404_v25  ;;  %507 = vmatpush.msrb.mxu3 %v420_v26  ;;  %v311_v26 = vperm.slane %v307_v17, 2 }
 0x2d8   :  { %620 = vmatpush.msra.mxu2 %v567_v27  ;;  %640 = vmatpush.msra.mxu3 %v583_v28  ;;  %v312_v27 = vperm.slane %v307_v17, 3 }
 0x2da   :  { %621 = vmatpush.msra.mxu2 %v566_v29  ;;  %641 = vmatpush.msra.mxu3 %v582_v30 }
 0x2dc   :  { %622 = vmatpush.msra.mxu2 %v565_v31  ;;  %642 = vmatpush.msra.mxu3 %v581_v32 }
 0x2de   :  { %623 = vmatpush.msra.mxu2 %v564_v33  ;;  %643 = vmatpush.msra.mxu3 %v580_v34  ;;  %v789_v34 = vld [vmem:[%s1500_s6] ss:$0 sm:$0xff]  ;;  %s849_s6 = smov [#allocation4]  }
 0x2e0   :  { %624 = vmatpush.msra.mxu2 %v563_v35  ;;  %644 = vmatpush.msra.mxu3 %v579_v36 }
 0x2e2   :  { %625 = vmatpush.msra.mxu2 %v562_v37  ;;  %645 = vmatpush.msra.mxu3 %v578_v38 }
 0x2e4   :  { %626 = vmatpush.msra.mxu2 %v561_v39  ;;  %646 = vmatpush.msra.mxu3 %v577_v40 }
 0x2e6   :  { %627 = vmatpush.msra.mxu2 %v560_v41  ;;  %647 = vmatpush.msra.mxu3 %v576_v42  ;;  %v790_v42 = vld [vmem:[%s1502_s8] ss:$0 sm:$0xff]  ;;  %s728_s8 = sshll.u32 %s849_s6, 4  ;;  %s729_s8 = int_to_ptr.vmem [resolvable:$true] %s728_s8 }
 0x2e8   :  { %628 = vmatpush.msra.mxu2 %v559_v43  ;;  %648 = vmatpush.msra.mxu3 %v575_v44 }
 0x2ea   :  { %629 = vmatpush.msra.mxu2 %v558_v45  ;;  %649 = vmatpush.msra.mxu3 %v574_v46 }
 0x2ec   :  { %630 = vmatpush.msra.mxu2 %v557_v49  ;;  %650 = vmatpush.msra.mxu3 %v573_v50 }
 0x2ee   :  { %631 = vmatpush.msra.mxu2 %v556_v53  ;;  %651 = vmatpush.msra.mxu3 %v572_v54 }
 0x2f0   :  { %632 = vmatpush.msra.mxu2 %v555_v57  ;;  %652 = vmatpush.msra.mxu3 %v571_v58 }
 0x2f2   :  { %633 = vmatpush.msra.mxu2 %v554_v61  ;;  %653 = vmatpush.msra.mxu3 %v570_v62 }
 0x2f4   :  { %634 = vmatpush.msra.mxu2 %v553_v1  ;;  %654 = vmatpush.msra.mxu3 %v569_v2 }
 0x2f6   :  { %635 = vmatpush.msra.mxu2 %v552_v5  ;;  %655 = vmatpush.msra.mxu3 %v568_v6 }
 0x33a   :  { %v337_v20 = vpop.f32.mrf.mxu2  ;;  %v357_v21 = vpop.f32.mrf.mxu3 }
 0x33b   :  { %v338_v22 = vadd.f32 %v337_v20, %v309_v18  ;;  %v358_v23 = vadd.f32 %v357_v21, %v310_v19 }
 0x33d   :  { %v400_v24 = vmax.f32 %v338_v22, 0.0  ;;  %v401_v25 = vmax.f32 %v358_v23, 0.0 }
 0x33f   :  { %488 = vmatmul.f32.vlgmr.msrb.gmra.mxu2 %v400_v24  ;;  %508 = vmatmul.f32.vlgmr.msrb.gmra.mxu3 %v401_v25 }
 0x342   :  { %v377_v28 = vpop.f32.mrf.mxu2  ;;  %v397_v29 = vpop.f32.mrf.mxu3 }
 0x343   :  { %v378_v30 = vadd.f32 %v377_v28, %v311_v26  ;;  %v398_v31 = vadd.f32 %v397_v29, %v312_v27 }
 0x345   :  { %v402_v32 = vmax.f32 %v378_v30, 0.0  ;;  %v403_v33 = vmax.f32 %v398_v31, 0.0 }
 0x347   :  { %528 = vmatmul.f32.vlgmr.msrb.gmra.mxu0 %v402_v32  ;;  %548 = vmatmul.f32.vlgmr.msrb.gmra.mxu1 %v403_v33 }
 0x348   :  { %636 = vmatmul.f32.vlgmr.msra.gmra.mxu2 %v400_v24  ;;  %656 = vmatmul.f32.vlgmr.msra.gmra.mxu3 %v401_v25 }
 0x34f   :  { %676 = vmatmul.f32.vlgmr.msra.gmra.mxu0 %v402_v32  ;;  %696 = vmatmul.f32.vlgmr.msra.gmra.mxu1 %v403_v33 }
 0x3c2   :  { %v489_v35 = vpop.f32.mrf.mxu2  ;;  %v509_v37 = vpop.f32.mrf.mxu3 }
 0x3c3   :  { %v490_v36 = vadd.f32 %v789_v34, %v489_v35 }
 0x3c4   :  { %v529_v39 = vpop.f32.mrf.mxu0  ;;  %v549_v41 = vpop.f32.mrf.mxu1 }
 0x3c5   :  { %v510_v38 = vadd.f32 %v509_v37, %v490_v36 }
 0x3c7   :  { %v530_v40 = vadd.f32 %v529_v39, %v510_v38 }
 0x3c9   :  { %v550_v43 = vadd.f32 %v549_v41, %v530_v40 }
 0x3cb   :  { %710 = vst.msk [vmem:[#allocation2] sm:$0xff] %vm70_vm0, %v550_v43  ;;  %v637_v44 = vpop.f32.mrf.mxu2  ;;  %v657_v46 = vpop.f32.mrf.mxu3 }
 0x3cc   :  { %v638_v45 = vadd.f32 %v790_v42, %v637_v44  ;;  %722 = dma.vmem_to_hbm [thread:$0]  %s718_s19, 128, %s720_s20, [#allocation3]   ;;  %v677_v48 = vpop.f32.mrf.mxu0  ;;  %v697_v50 = vpop.f32.mrf.mxu1 }
 0x3ce   :  { %v658_v47 = vadd.f32 %v657_v46, %v638_v45 }
 0x3d0   :  { %v678_v49 = vadd.f32 %v677_v48, %v658_v47 }
 0x3d2   :  { %v698_v51 = vadd.f32 %v697_v50, %v678_v49 }
 0x3d4   :  { %v701_v52 = vand.u32 2147483647, %v698_v51  ;;  %v700_v58 = vmax.f32 %v698_v51, 0.0 }
 0x3d6   :  { %v702_v53 = vsub.f32 0.0, %v701_v52 }
 0x3d8   :  { %v703_v54 = vmul.f32 1.442695, %v702_v53 }
 0x3da   :  { %791 = vpow2.f32 %v703_v54 }
 0x3e0   :  { %v792_v55 = vpop.eup %791 }
 0x3e1   :  { %v705_v56 = vadd.f32 1.0, %v792_v55 }
 0x3e3   :  { %793 = vlog2.f32 %v705_v56 }
 0x3e9   :  { %v794_v57 = vpop.eup %793 }
 0x3ea   :  { %v707_v59 = vmul.f32 0.6931472, %v794_v57 }
 0x3ec   :  { %v708_v60 = vadd.f32 %v707_v59, %v700_v58 }
 0x3ee   :  { %v709_v61 = vadd.f32 0.0001, %v708_v60 }
 0x3f0   :  { %711 = vst.msk [vmem:[#allocation4] sm:$0xff] %vm70_vm0, %v709_v61 }
 0x3f1   :  { %733 = dma.vmem_to_hbm [thread:$0]  %s729_s8, 128, %s731_s24, [#allocation5]  }
 0x3f2   :  { %843 = dma.done.wait [#allocation3], 128  }
 0x3f3   :  { %844 = vsyncadd [#allocation3], 4294967168 }
 0x3f4   :  { %845 = dma.done.wait [#allocation5], 128  }
 0x3f5   :  { %846 = vsyncadd [#allocation5], 4294967168 }
 0x3f6   :  { %742 = vsyncpa [#allocation3], 1 }
 0x3f7   :  { %743 = vsyncpa [#allocation5], 1 }

</bundles_post_ra>
